<compile_context>
chip_gen: v6e
topology: v6e:2x2x1
jax: 0.10.0
libtpu: 0.0.40
codegen_flags: <defaults>
</compile_context>

<pallas_src>
import functools

import numpy as np
import jax
import jax.numpy as jnp
from jax import lax
from jax.experimental import pallas as pl
from jax.experimental.pallas import tpu as pltpu


def _round_up(v, m):
    return (v + m - 1) // m * m


def _pad2d(a, shape):
    return jnp.pad(a, [(0, s - d) for d, s in zip(a.shape, shape)])


# ---------------------------------------------------------------------------
# Pallas kernel: in-kernel embedding selection (one-hot @ folded proj) + MLP.
# ---------------------------------------------------------------------------
def _mlp_kernel(n_hidden, num_tasks_p, output_limit, compute_dtype, *refs):
    # refs layout (all VMEM tiles):
    #   refs[0] : x          (TB, dim_in_p)          compute_dtype
    #   refs[1] : task_ids   (TB, 1)                 int32
    #   refs[2] : W0_top     (dim_in_p, H0p)         compute_dtype
    #   refs[3] : proj       (num_tasks_p, H0p)      compute_dtype  (= table @ W0_bot)
    #   refs[4] : b0         (1, H0p)                f32
    #   refs[5 + 2*(i-1)], refs[6 + 2*(i-1)] : W_i, b_i   for i in 1..n_hidden-1
    #   refs[5 + 2*(n_hidden-1)], refs[6 + ...]      : Wout, bout
    #   refs[-1]: output     (TB, DOUTp)             f32
    x_ref, ids_ref, w0x_ref, proj_ref, b0_ref = refs[:5]
    o_ref = refs[-1]
    tb = x_ref.shape[0]

    # In-kernel embedding lookup fused with layer 0: one_hot(ids) @ proj picks
    # the pre-projected embedding row (exact row selection, f32 accumulate).
    ids = ids_ref[...]                                               # (TB, 1) i32
    one_hot = (lax.broadcasted_iota(jnp.int32, (tb, num_tasks_p), 1) == ids
               ).astype(compute_dtype)                               # (TB, NTp)

    # Layer 0: tanh(x @ W0_top + one_hot @ proj + b0) == tanh([x, emb] @ W0 + b0)
    h = (jnp.dot(x_ref[...], w0x_ref[...], preferred_element_type=jnp.float32)
         + jnp.dot(one_hot, proj_ref[...], preferred_element_type=jnp.float32)
         + b0_ref[...])
    h = jnp.tanh(h)                                                  # f32

    # Hidden layers 1..n_hidden-1
    for i in range(1, n_hidden):
        w_ref = refs[5 + 2 * (i - 1)]
        b_ref = refs[6 + 2 * (i - 1)]
        h = jnp.tanh(jnp.dot(h.astype(compute_dtype), w_ref[...],
                             preferred_element_type=jnp.float32) + b_ref[...])

    # Output layer
    wo_ref = refs[5 + 2 * (n_hidden - 1)]
    bo_ref = refs[6 + 2 * (n_hidden - 1)]
    out = jnp.dot(h.astype(compute_dtype), wo_ref[...],
                  preferred_element_type=jnp.float32) + bo_ref[...]
    if output_limit is not None:
        out = jnp.tanh(out) * output_limit

    o_ref[...] = out.astype(o_ref.dtype)


# ---------------------------------------------------------------------------
# One-time parameter preparation (hoisted out of the per-call hot path).
# ---------------------------------------------------------------------------
def prepare_params(params, *, output_limit=None, compute_dtype=jnp.bfloat16,
                   lane=128):
    """Pad / cast / fold the Embedding_NN parameters once.

    params: dict with
      'embedding' : (num_tasks, embedding_dim) f32
      'layers'    : [(W_i, b_i), ...]  with W stored as (in, out)
      'fcout'     : (Wout, bout)
    """
    emb_table = params["embedding"]
    layers = params["layers"]
    w_out, b_out = params["fcout"]

    num_tasks, emb_dim = emb_table.shape
    dim_out = int(w_out.shape[1])
    n_hidden = len(layers)

    w0, b0 = layers[0]
    dim_in = int(w0.shape[0]) - emb_dim

    # Lane-dense padded feature dims (zero padding -> exact semantics).
    hidden_p = [_round_up(int(w.shape[1]), lane) for w, _ in layers]
    dout_p = _round_up(dim_out, lane)
    num_tasks_p = _round_up(num_tasks, 8)
    # Only pad the x / W0_top contraction dim when it is both >lane and
    # misaligned; for small dim_in the full-array block is already legal and
    # padding would only inflate the streamed x traffic.
    dim_in_p = dim_in if dim_in <= lane or dim_in % lane == 0 \
        else _round_up(dim_in, lane)

    # Split W0 so the concatenated x_embed never materializes, and fold the
    # embedding projection offline (f32): proj[t] = emb_table[t] @ W0_bot.
    w0_top = w0[:dim_in]
    w0_bot = w0[dim_in:]
    proj = jnp.dot(emb_table.astype(jnp.float32), w0_bot.astype(jnp.float32))

    operands = [
        _pad2d(w0_top, (dim_in_p, hidden_p[0])).astype(compute_dtype),
        _pad2d(proj, (num_tasks_p, hidden_p[0])).astype(compute_dtype),
        _pad2d(b0.reshape(1, -1), (1, hidden_p[0])).astype(jnp.float32),
    ]
    prev_p = hidden_p[0]
    for li in range(1, n_hidden):
        w, b = layers[li]
        hp = hidden_p[li]
        operands.append(_pad2d(w, (prev_p, hp)).astype(compute_dtype))
        operands.append(_pad2d(b.reshape(1, -1), (1, hp)).astype(jnp.float32))
        prev_p = hp
    operands.append(_pad2d(w_out, (prev_p, dout_p)).astype(compute_dtype))
    operands.append(_pad2d(b_out.reshape(1, -1), (1, dout_p)).astype(jnp.float32))

    # Materialize now so the pads/casts never run again in the per-call path.
    operands = [jax.block_until_ready(jnp.asarray(op)) for op in operands]

    return {
        "operands": operands,
        "dims": dict(dim_in=dim_in, dim_in_p=dim_in_p, dim_out=dim_out,
                     dout_p=dout_p, hidden_p=hidden_p, n_hidden=n_hidden,
                     num_tasks=num_tasks, num_tasks_p=num_tasks_p,
                     emb_dim=emb_dim),
        "compute_dtype": compute_dtype,
        "output_limit": output_limit,
    }


def _select_batch_tile(B):
    # Small B: one grid step covering everything (8-row sublane multiple).
    # Large B: >= 2 grid steps so v7x's two TensorCores both get work via
    # dimension_semantics=("parallel",); tiles >= 256 rows so per-step overhead
    # amortizes; capped at 512 rows to bound the per-core VMEM footprint.
    if B <= 256:
        return _round_up(B, 8)
    return min(512, _round_up(-(-B // 2), 256))


def _vmem_bytes_estimate(tb, dim_in_p, dout_p, hidden_p, operands_w,
                         compute_dtype, single_buffer_weights):
    wmult = 1 if single_buffer_weights else 2
    weight_bytes = sum(int(o.size) * o.dtype.itemsize for o in operands_w) * wmult
    cb = np.dtype(compute_dtype).itemsize
    stream_bytes = 2 * (tb * dim_in_p * cb + tb * 4 + tb * dout_p * 4)
    act_bytes = 4 * tb * max(hidden_p + [dout_p]) * 4   # live f32 activations
    return weight_bytes + stream_bytes + act_bytes


# ---------------------------------------------------------------------------
# Forward pass (per-call work: pad/cast x + pallas_call only).
# ---------------------------------------------------------------------------
def embedding_nn_forward(x, task_ids, prepared, *, batch_tile=None):
    dims = prepared["dims"]
    compute_dtype = prepared["compute_dtype"]
    output_limit = prepared["output_limit"]
    operands_w = prepared["operands"]

    B = x.shape[0]
    dim_in, dim_in_p = dims["dim_in"], dims["dim_in_p"]
    dim_out, dout_p = dims["dim_out"], dims["dout_p"]
    hidden_p, n_hidden = dims["hidden_p"], dims["n_hidden"]
    num_tasks_p = dims["num_tasks_p"]

    tb = batch_tile if batch_tile is not None else _select_batch_tile(B)
    bp = _round_up(B, tb)
    grid = (bp // tb,)

    # Per-call streamed inputs: x in compute_dtype (bf16), ids in int32.
    x_p = _pad2d(x.astype(jnp.float32), (bp, dim_in_p)).astype(compute_dtype)
    ids_p = _pad2d(task_ids.reshape(-1, 1).astype(jnp.int32), (bp, 1))

    kernel = functools.partial(_mlp_kernel, n_hidden, num_tasks_p,
                               output_limit, compute_dtype)

    # Advisory cost estimate for XLA's scheduler.
    flops = 2 * bp * (dim_in_p + num_tasks_p) * hidden_p[0]
    prev = hidden_p[0]
    for hp in hidden_p[1:]:
        flops += 2 * bp * prev * hp
        prev = hp
    flops += 2 * bp * prev * dout_p
    transcendentals = bp * sum(hidden_p)
    if output_limit is not None:
        transcendentals += bp * dout_p
    bytes_accessed = (sum(int(o.size) * o.dtype.itemsize for o in operands_w)
                      + int(x_p.size) * x_p.dtype.itemsize
                      + int(ids_p.size) * 4
                      + bp * dout_p * 4)

    def run(single_buffer_weights):
        const_kw = ({"pipeline_mode": pl.Buffered(1)}
                    if single_buffer_weights else {})
        in_specs = [
            pl.BlockSpec((tb, dim_in_p), lambda i: (i, 0)),
            pl.BlockSpec((tb, 1), lambda i: (i, 0)),
        ]
        for op in operands_w:
            in_specs.append(pl.BlockSpec(op.shape, lambda i: (0, 0), **const_kw))
        out_specs = pl.BlockSpec((tb, dout_p), lambda i: (i, 0))

        est = _vmem_bytes_estimate(tb, dim_in_p, dout_p, hidden_p, operands_w,
                                   compute_dtype, single_buffer_weights)
        # Generous headroom, but stay under v7x's 64 MiB per-TC VMEM.
        vmem_limit = int(min(max(2 * est, 32 << 20), 60 << 20))

        return pl.pallas_call(
            kernel,
            out_shape=jax.ShapeDtypeStruct((bp, dout_p), jnp.float32),
            grid=grid,
            in_specs=in_specs,
            out_specs=out_specs,
            compiler_params=pltpu.CompilerParams(
                # "parallel" -> v7x shards the batch grid across its 2 TCs;
                # harmless on v5e/v6e.
                dimension_semantics=("parallel",),
                vmem_limit_bytes=vmem_limit),
            cost_estimate=pl.CostEstimate(
                flops=flops,
                transcendentals=transcendentals,
                bytes_accessed=bytes_accessed),
        )(x_p, ids_p, *operands_w)

    try:
        # Preferred: resident weights single-buffered (half the VMEM cost).
        out_p = run(True)
    except Exception:
        # Fallback for jax builds that reject Buffered(1): default buffering.
        out_p = run(False)

    return out_p[:B, :dim_out]


# ---------------------------------------------------------------------------
# Deterministic parameter construction (shapes from Embedding_NN.__init__).
# ---------------------------------------------------------------------------
def init_params(key, dim_in, hidden, dim_out, embedding_dim, num_tasks):
    keys = jax.random.split(key, 2 * (len(hidden) + 1) + 1)
    k = iter(keys)

    embedding = jax.random.normal(next(k), (num_tasks, embedding_dim), jnp.float32)

    layers = []
    fan_in = dim_in + embedding_dim
    for h in hidden:
        bound = 1.0 / jnp.sqrt(fan_in)
        w = jax.random.uniform(next(k), (fan_in, h), jnp.float32, -bound, bound)
        b = jax.random.uniform(next(k), (h,), jnp.float32, -bound, bound)
        layers.append((w, b))
        fan_in = h

    bound = 1.0 / jnp.sqrt(fan_in)
    w_out = jax.random.uniform(next(k), (fan_in, dim_out), jnp.float32, -bound, bound)
    b_out = jax.random.uniform(next(k), (dim_out,), jnp.float32, -bound, bound)

    return {"embedding": embedding, "layers": layers, "fcout": (w_out, b_out)}


# Pure-JAX reference (f32) for a sanity check.
def _ref_forward(x, task_ids, params, output_limit=None):
    emb = jnp.take(params["embedding"], task_ids, axis=0)
    h = jnp.concatenate([x, emb], axis=1)
    for w, b in params["layers"]:
        h = jnp.tanh(h @ w + b)
    w_out, b_out = params["fcout"]
    out = h @ w_out + b_out
    if output_limit is not None:
        out = jnp.tanh(out) * output_limit
    return out


if __name__ == "__main__":
    # Small shapes consistent with the module's forward.
    B = 16
    dim_in = 16
    embedding_dim = 8
    hidden = (32, 32)
    dim_out = 4
    num_tasks = 4

    key = jax.random.PRNGKey(0)
    k_param, k_x, k_id = jax.random.split(key, 3)

    params = init_params(k_param, dim_in, hidden, dim_out, embedding_dim, num_tasks)
    x = jax.random.normal(k_x, (B, dim_in), jnp.float32)
    task_ids = jax.random.randint(k_id, (B,), 0, num_tasks, jnp.int32)

    # --- default Embedding_NN branch (output_limit=None) ---------------------
    prepared = prepare_params(params, output_limit=None)
    # batch_tile=8 -> 2 grid steps; exercises the weight-resident batch grid.
    # (Tiny tiles are for this test only; production uses _select_batch_tile.)
    out = embedding_nn_forward(x, task_ids, prepared, batch_tile=8)
    out = jax.block_until_ready(out)

    ref = _ref_forward(x, task_ids, params, None)
    assert out.shape == (B, dim_out)
    # bf16 MXU operands (f32 accumulate) -> loosened tolerance vs f32 ref.
    assert jnp.allclose(out, ref, atol=3e-2, rtol=3e-2), "mismatch vs reference"

    # --- output_limit branch (tanh(out) * limit) ------------------------------
    limit = 1.5
    prepared_lim = prepare_params(params, output_limit=limit)
    out_lim = jax.block_until_ready(
        embedding_nn_forward(x, task_ids, prepared_lim, batch_tile=8))
    ref_lim = _ref_forward(x, task_ids, params, limit)
    assert jnp.allclose(out_lim, ref_lim, atol=3e-2, rtol=3e-2), \
        "mismatch vs reference (output_limit)"

    print("KERNEL_OK")
</pallas_src>

<mosaic_0001>
module attributes {stable_mosaic.version = 11 : i64} {
  func.func @_mlp_kernel(%arg0: i32, %arg1: memref<8x16xbf16, #tpu.memory_space<vmem>>, %arg2: memref<8x1xi32, #tpu.memory_space<vmem>>, %arg3: memref<16x128xbf16, #tpu.memory_space<vmem>>, %arg4: memref<8x128xbf16, #tpu.memory_space<vmem>>, %arg5: memref<1x128xf32, #tpu.memory_space<vmem>>, %arg6: memref<128x128xbf16, #tpu.memory_space<vmem>>, %arg7: memref<1x128xf32, #tpu.memory_space<vmem>>, %arg8: memref<128x128xbf16, #tpu.memory_space<vmem>>, %arg9: memref<1x128xf32, #tpu.memory_space<vmem>>, %arg10: memref<8x128xf32, #tpu.memory_space<vmem>>) attributes {dimension_semantics = [#tpu.dimension_semantics<parallel>], iteration_bounds = array<i64: 2>, scalar_prefetch = 0 : i64, scratch_operands = 0 : i64, tpu.core_type = #tpu.core_type<tc>, window_params = [{transform_indices = @transform_0, window_bounds = array<i64: 8, 16>}, {transform_indices = @transform_1, window_bounds = array<i64: 8, 1>}, {pipeline_mode = #tpu.pipeline_mode<synchronous>, transform_indices = @transform_2, window_bounds = array<i64: 16, 128>}, {pipeline_mode = #tpu.pipeline_mode<synchronous>, transform_indices = @transform_3, window_bounds = array<i64: 8, 128>}, {pipeline_mode = #tpu.pipeline_mode<synchronous>, transform_indices = @transform_4, window_bounds = array<i64: 1, 128>}, {pipeline_mode = #tpu.pipeline_mode<synchronous>, transform_indices = @transform_5, window_bounds = array<i64: 128, 128>}, {pipeline_mode = #tpu.pipeline_mode<synchronous>, transform_indices = @transform_6, window_bounds = array<i64: 1, 128>}, {pipeline_mode = #tpu.pipeline_mode<synchronous>, transform_indices = @transform_7, window_bounds = array<i64: 128, 128>}, {pipeline_mode = #tpu.pipeline_mode<synchronous>, transform_indices = @transform_8, window_bounds = array<i64: 1, 128>}, {transform_indices = @transform_9, window_bounds = array<i64: 8, 128>}]} {
    %c0 = arith.constant 0 : index
    %c0_0 = arith.constant 0 : index
    %0 = vector.load %arg2[%c0, %c0_0] : memref<8x1xi32, #tpu.memory_space<vmem>>, vector<8x1xi32>
    %1 = tpu.iota {dimensions = array<i32: 1>} : vector<8x8xi32>
    %2 = vector.broadcast %0 : vector<8x1xi32> to vector<8x8xi32>
    %3 = arith.cmpi eq, %1, %2 : vector<8x8xi32>
    %4 = arith.extui %3 : vector<8x8xi1> to vector<8x8xi32>
    %5 = arith.sitofp %4 : vector<8x8xi32> to vector<8x8xf32>
    %6 = arith.truncf %5 : vector<8x8xf32> to vector<8x8xbf16>
    %c0_1 = arith.constant 0 : index
    %c0_2 = arith.constant 0 : index
    %7 = vector.load %arg1[%c0_1, %c0_2] : memref<8x16xbf16, #tpu.memory_space<vmem>>, vector<8x16xbf16>
    %c0_3 = arith.constant 0 : index
    %c0_4 = arith.constant 0 : index
    %8 = vector.load %arg3[%c0_3, %c0_4] : memref<16x128xbf16, #tpu.memory_space<vmem>>, vector<16x128xbf16>
    %cst = arith.constant dense<0.000000e+00> : vector<8x128xf32>
    %9 = tpu.matmul %7, %8, %cst {dimension_numbers = #tpu.dot_dimension_numbers<[1], [0], [0], [1], [0, 0, 1, 1], [], []>} : vector<8x16xbf16>, vector<16x128xbf16>, vector<8x128xf32> -> vector<8x128xf32>
    %c0_5 = arith.constant 0 : index
    %c0_6 = arith.constant 0 : index
    %10 = vector.load %arg4[%c0_5, %c0_6] : memref<8x128xbf16, #tpu.memory_space<vmem>>, vector<8x128xbf16>
    %cst_7 = arith.constant dense<0.000000e+00> : vector<8x128xf32>
    %11 = tpu.matmul %6, %10, %cst_7 {dimension_numbers = #tpu.dot_dimension_numbers<[1], [0], [0], [1], [0, 0, 1, 1], [], []>} : vector<8x8xbf16>, vector<8x128xbf16>, vector<8x128xf32> -> vector<8x128xf32>
    %12 = arith.addf %9, %11 : vector<8x128xf32>
    %c0_8 = arith.constant 0 : index
    %c0_9 = arith.constant 0 : index
    %13 = vector.load %arg5[%c0_8, %c0_9] : memref<1x128xf32, #tpu.memory_space<vmem>>, vector<1x128xf32>
    %14 = vector.broadcast %13 : vector<1x128xf32> to vector<8x128xf32>
    %15 = arith.addf %12, %14 : vector<8x128xf32>
    %16 = math.tanh %15 : vector<8x128xf32>
    %17 = arith.truncf %16 : vector<8x128xf32> to vector<8x128xbf16>
    %c0_10 = arith.constant 0 : index
    %c0_11 = arith.constant 0 : index
    %18 = vector.load %arg6[%c0_10, %c0_11] : memref<128x128xbf16, #tpu.memory_space<vmem>>, vector<128x128xbf16>
    %cst_12 = arith.constant dense<0.000000e+00> : vector<8x128xf32>
    %19 = tpu.matmul %17, %18, %cst_12 {dimension_numbers = #tpu.dot_dimension_numbers<[1], [0], [0], [1], [0, 0, 1, 1], [], []>} : vector<8x128xbf16>, vector<128x128xbf16>, vector<8x128xf32> -> vector<8x128xf32>
    %c0_13 = arith.constant 0 : index
    %c0_14 = arith.constant 0 : index
    %20 = vector.load %arg7[%c0_13, %c0_14] : memref<1x128xf32, #tpu.memory_space<vmem>>, vector<1x128xf32>
    %21 = vector.broadcast %20 : vector<1x128xf32> to vector<8x128xf32>
    %22 = arith.addf %19, %21 : vector<8x128xf32>
    %23 = math.tanh %22 : vector<8x128xf32>
    %24 = arith.truncf %23 : vector<8x128xf32> to vector<8x128xbf16>
    %c0_15 = arith.constant 0 : index
    %c0_16 = arith.constant 0 : index
    %25 = vector.load %arg8[%c0_15, %c0_16] : memref<128x128xbf16, #tpu.memory_space<vmem>>, vector<128x128xbf16>
    %cst_17 = arith.constant dense<0.000000e+00> : vector<8x128xf32>
    %26 = tpu.matmul %24, %25, %cst_17 {dimension_numbers = #tpu.dot_dimension_numbers<[1], [0], [0], [1], [0, 0, 1, 1], [], []>} : vector<8x128xbf16>, vector<128x128xbf16>, vector<8x128xf32> -> vector<8x128xf32>
    %c0_18 = arith.constant 0 : index
    %c0_19 = arith.constant 0 : index
    %27 = vector.load %arg9[%c0_18, %c0_19] : memref<1x128xf32, #tpu.memory_space<vmem>>, vector<1x128xf32>
    %28 = vector.broadcast %27 : vector<1x128xf32> to vector<8x128xf32>
    %29 = arith.addf %26, %28 : vector<8x128xf32>
    %c0_20 = arith.constant 0 : index
    %c0_21 = arith.constant 0 : index
    %30 = vector.load %arg10[%c0_20, %c0_21] : memref<8x128xf32, #tpu.memory_space<vmem>>, vector<8x128xf32>
    tpu.vector_store %arg10[%c0_20, %c0_21], %29 {strides = array<i32>} : memref<8x128xf32, #tpu.memory_space<vmem>>, vector<8x128xf32>,
    return
  }
  func.func @transform_0(%arg0: i32) -> (i32, i32) {
    %c0_i32 = arith.constant 0 : i32
    %c0_i32_0 = arith.constant 0 : i32
    return %arg0, %c0_i32 : i32, i32
  }
  func.func @transform_1(%arg0: i32) -> (i32, i32) {
    %c0_i32 = arith.constant 0 : i32
    %c0_i32_0 = arith.constant 0 : i32
    return %arg0, %c0_i32 : i32, i32
  }
  func.func @transform_2(%arg0: i32) -> (i32, i32) {
    %c0_i32 = arith.constant 0 : i32
    %c0_i32_0 = arith.constant 0 : i32
    %c0_i32_1 = arith.constant 0 : i32
    return %c0_i32, %c0_i32_0 : i32, i32
  }
  func.func @transform_3(%arg0: i32) -> (i32, i32) {
    %c0_i32 = arith.constant 0 : i32
    %c0_i32_0 = arith.constant 0 : i32
    %c0_i32_1 = arith.constant 0 : i32
    return %c0_i32, %c0_i32_0 : i32, i32
  }
  func.func @transform_4(%arg0: i32) -> (i32, i32) {
    %c0_i32 = arith.constant 0 : i32
    %c0_i32_0 = arith.constant 0 : i32
    %c0_i32_1 = arith.constant 0 : i32
    return %c0_i32, %c0_i32_0 : i32, i32
  }
  func.func @transform_5(%arg0: i32) -> (i32, i32) {
    %c0_i32 = arith.constant 0 : i32
    %c0_i32_0 = arith.constant 0 : i32
    %c0_i32_1 = arith.constant 0 : i32
    return %c0_i32, %c0_i32_0 : i32, i32
  }
  func.func @transform_6(%arg0: i32) -> (i32, i32) {
    %c0_i32 = arith.constant 0 : i32
    %c0_i32_0 = arith.constant 0 : i32
    %c0_i32_1 = arith.constant 0 : i32
    return %c0_i32, %c0_i32_0 : i32, i32
  }
  func.func @transform_7(%arg0: i32) -> (i32, i32) {
    %c0_i32 = arith.constant 0 : i32
    %c0_i32_0 = arith.constant 0 : i32
    %c0_i32_1 = arith.constant 0 : i32
    return %c0_i32, %c0_i32_0 : i32, i32
  }
  func.func @transform_8(%arg0: i32) -> (i32, i32) {
    %c0_i32 = arith.constant 0 : i32
    %c0_i32_0 = arith.constant 0 : i32
    %c0_i32_1 = arith.constant 0 : i32
    return %c0_i32, %c0_i32_0 : i32, i32
  }
  func.func @transform_9(%arg0: i32) -> (i32, i32) {
    %c0_i32 = arith.constant 0 : i32
    %c0_i32_0 = arith.constant 0 : i32
    return %arg0, %c0_i32 : i32, i32
  }
}

module attributes {stable_mosaic.version = 11 : i64} {
  func.func @_mlp_kernel(%arg0: i32, %arg1: memref<8x16xbf16, #tpu.memory_space<vmem>>, %arg2: memref<8x1xi32, #tpu.memory_space<vmem>>, %arg3: memref<16x128xbf16, #tpu.memory_space<vmem>>, %arg4: memref<8x128xbf16, #tpu.memory_space<vmem>>, %arg5: memref<1x128xf32, #tpu.memory_space<vmem>>, %arg6: memref<128x128xbf16, #tpu.memory_space<vmem>>, %arg7: memref<1x128xf32, #tpu.memory_space<vmem>>, %arg8: memref<128x128xbf16, #tpu.memory_space<vmem>>, %arg9: memref<1x128xf32, #tpu.memory_space<vmem>>, %arg10: memref<8x128xf32, #tpu.memory_space<vmem>>) attributes {dimension_semantics = [#tpu.dimension_semantics<parallel>], iteration_bounds = array<i64: 2>, scalar_prefetch = 0 : i64, scratch_operands = 0 : i64, tpu.core_type = #tpu.core_type<tc>, window_params = [{transform_indices = @transform_0, window_bounds = array<i64: 8, 16>}, {transform_indices = @transform_1, window_bounds = array<i64: 8, 1>}, {pipeline_mode = #tpu.pipeline_mode<synchronous>, transform_indices = @transform_2, window_bounds = array<i64: 16, 128>}, {pipeline_mode = #tpu.pipeline_mode<synchronous>, transform_indices = @transform_3, window_bounds = array<i64: 8, 128>}, {pipeline_mode = #tpu.pipeline_mode<synchronous>, transform_indices = @transform_4, window_bounds = array<i64: 1, 128>}, {pipeline_mode = #tpu.pipeline_mode<synchronous>, transform_indices = @transform_5, window_bounds = array<i64: 128, 128>}, {pipeline_mode = #tpu.pipeline_mode<synchronous>, transform_indices = @transform_6, window_bounds = array<i64: 1, 128>}, {pipeline_mode = #tpu.pipeline_mode<synchronous>, transform_indices = @transform_7, window_bounds = array<i64: 128, 128>}, {pipeline_mode = #tpu.pipeline_mode<synchronous>, transform_indices = @transform_8, window_bounds = array<i64: 1, 128>}, {transform_indices = @transform_9, window_bounds = array<i64: 8, 128>}]} {
    %c0 = arith.constant 0 : index
    %c0_0 = arith.constant 0 : index
    %0 = vector.load %arg2[%c0, %c0_0] : memref<8x1xi32, #tpu.memory_space<vmem>>, vector<8x1xi32>
    %1 = tpu.iota {dimensions = array<i32: 1>} : vector<8x8xi32>
    %2 = vector.broadcast %0 : vector<8x1xi32> to vector<8x8xi32>
    %3 = arith.cmpi eq, %1, %2 : vector<8x8xi32>
    %4 = arith.extui %3 : vector<8x8xi1> to vector<8x8xi32>
    %5 = arith.sitofp %4 : vector<8x8xi32> to vector<8x8xf32>
    %6 = arith.truncf %5 : vector<8x8xf32> to vector<8x8xbf16>
    %c0_1 = arith.constant 0 : index
    %c0_2 = arith.constant 0 : index
    %7 = vector.load %arg1[%c0_1, %c0_2] : memref<8x16xbf16, #tpu.memory_space<vmem>>, vector<8x16xbf16>
    %c0_3 = arith.constant 0 : index
    %c0_4 = arith.constant 0 : index
    %8 = vector.load %arg3[%c0_3, %c0_4] : memref<16x128xbf16, #tpu.memory_space<vmem>>, vector<16x128xbf16>
    %cst = arith.constant dense<0.000000e+00> : vector<8x128xf32>
    %9 = tpu.matmul %7, %8, %cst {dimension_numbers = #tpu.dot_dimension_numbers<[1], [0], [0], [1], [0, 0, 1, 1], [], []>} : vector<8x16xbf16>, vector<16x128xbf16>, vector<8x128xf32> -> vector<8x128xf32>
    %c0_5 = arith.constant 0 : index
    %c0_6 = arith.constant 0 : index
    %10 = vector.load %arg4[%c0_5, %c0_6] : memref<8x128xbf16, #tpu.memory_space<vmem>>, vector<8x128xbf16>
    %cst_7 = arith.constant dense<0.000000e+00> : vector<8x128xf32>
    %11 = tpu.matmul %6, %10, %cst_7 {dimension_numbers = #tpu.dot_dimension_numbers<[1], [0], [0], [1], [0, 0, 1, 1], [], []>} : vector<8x8xbf16>, vector<8x128xbf16>, vector<8x128xf32> -> vector<8x128xf32>
    %12 = arith.addf %9, %11 : vector<8x128xf32>
    %c0_8 = arith.constant 0 : index
    %c0_9 = arith.constant 0 : index
    %13 = vector.load %arg5[%c0_8, %c0_9] : memref<1x128xf32, #tpu.memory_space<vmem>>, vector<1x128xf32>
    %14 = vector.broadcast %13 : vector<1x128xf32> to vector<8x128xf32>
    %15 = arith.addf %12, %14 : vector<8x128xf32>
    %16 = math.tanh %15 : vector<8x128xf32>
    %17 = arith.truncf %16 : vector<8x128xf32> to vector<8x128xbf16>
    %c0_10 = arith.constant 0 : index
    %c0_11 = arith.constant 0 : index
    %18 = vector.load %arg6[%c0_10, %c0_11] : memref<128x128xbf16, #tpu.memory_space<vmem>>, vector<128x128xbf16>
    %cst_12 = arith.constant dense<0.000000e+00> : vector<8x128xf32>
    %19 = tpu.matmul %17, %18, %cst_12 {dimension_numbers = #tpu.dot_dimension_numbers<[1], [0], [0], [1], [0, 0, 1, 1], [], []>} : vector<8x128xbf16>, vector<128x128xbf16>, vector<8x128xf32> -> vector<8x128xf32>
    %c0_13 = arith.constant 0 : index
    %c0_14 = arith.constant 0 : index
    %20 = vector.load %arg7[%c0_13, %c0_14] : memref<1x128xf32, #tpu.memory_space<vmem>>, vector<1x128xf32>
    %21 = vector.broadcast %20 : vector<1x128xf32> to vector<8x128xf32>
    %22 = arith.addf %19, %21 : vector<8x128xf32>
    %23 = math.tanh %22 : vector<8x128xf32>
    %24 = arith.truncf %23 : vector<8x128xf32> to vector<8x128xbf16>
    %c0_15 = arith.constant 0 : index
    %c0_16 = arith.constant 0 : index
    %25 = vector.load %arg8[%c0_15, %c0_16] : memref<128x128xbf16, #tpu.memory_space<vmem>>, vector<128x128xbf16>
    %cst_17 = arith.constant dense<0.000000e+00> : vector<8x128xf32>
    %26 = tpu.matmul %24, %25, %cst_17 {dimension_numbers = #tpu.dot_dimension_numbers<[1], [0], [0], [1], [0, 0, 1, 1], [], []>} : vector<8x128xbf16>, vector<128x128xbf16>, vector<8x128xf32> -> vector<8x128xf32>
    %c0_18 = arith.constant 0 : index
    %c0_19 = arith.constant 0 : index
    %27 = vector.load %arg9[%c0_18, %c0_19] : memref<1x128xf32, #tpu.memory_space<vmem>>, vector<1x128xf32>
    %28 = vector.broadcast %27 : vector<1x128xf32> to vector<8x128xf32>
    %29 = arith.addf %26, %28 : vector<8x128xf32>
    %c0_20 = arith.constant 0 : index
    %c0_21 = arith.constant 0 : index
    %30 = vector.load %arg10[%c0_20, %c0_21] : memref<8x128xf32, #tpu.memory_space<vmem>>, vector<8x128xf32>
    tpu.vector_store %arg10[%c0_20, %c0_21], %29 {strides = array<i32>} : memref<8x128xf32, #tpu.memory_space<vmem>>, vector<8x128xf32>,
    return
  }
  func.func @transform_0(%arg0: i32) -> (i32, i32) {
    %c0_i32 = arith.constant 0 : i32
    %c0_i32_0 = arith.constant 0 : i32
    return %arg0, %c0_i32 : i32, i32
  }
  func.func @transform_1(%arg0: i32) -> (i32, i32) {
    %c0_i32 = arith.constant 0 : i32
    %c0_i32_0 = arith.constant 0 : i32
    return %arg0, %c0_i32 : i32, i32
  }
  func.func @transform_2(%arg0: i32) -> (i32, i32) {
    %c0_i32 = arith.constant 0 : i32
    %c0_i32_0 = arith.constant 0 : i32
    %c0_i32_1 = arith.constant 0 : i32
    return %c0_i32, %c0_i32_0 : i32, i32
  }
  func.func @transform_3(%arg0: i32) -> (i32, i32) {
    %c0_i32 = arith.constant 0 : i32
    %c0_i32_0 = arith.constant 0 : i32
    %c0_i32_1 = arith.constant 0 : i32
    return %c0_i32, %c0_i32_0 : i32, i32
  }
  func.func @transform_4(%arg0: i32) -> (i32, i32) {
    %c0_i32 = arith.constant 0 : i32
    %c0_i32_0 = arith.constant 0 : i32
    %c0_i32_1 = arith.constant 0 : i32
    return %c0_i32, %c0_i32_0 : i32, i32
  }
  func.func @transform_5(%arg0: i32) -> (i32, i32) {
    %c0_i32 = arith.constant 0 : i32
    %c0_i32_0 = arith.constant 0 : i32
    %c0_i32_1 = arith.constant 0 : i32
    return %c0_i32, %c0_i32_0 : i32, i32
  }
  func.func @transform_6(%arg0: i32) -> (i32, i32) {
    %c0_i32 = arith.constant 0 : i32
    %c0_i32_0 = arith.constant 0 : i32
    %c0_i32_1 = arith.constant 0 : i32
    return %c0_i32, %c0_i32_0 : i32, i32
  }
  func.func @transform_7(%arg0: i32) -> (i32, i32) {
    %c0_i32 = arith.constant 0 : i32
    %c0_i32_0 = arith.constant 0 : i32
    %c0_i32_1 = arith.constant 0 : i32
    return %c0_i32, %c0_i32_0 : i32, i32
  }
  func.func @transform_8(%arg0: i32) -> (i32, i32) {
    %c0_i32 = arith.constant 0 : i32
    %c0_i32_0 = arith.constant 0 : i32
    %c0_i32_1 = arith.constant 0 : i32
    return %c0_i32, %c0_i32_0 : i32, i32
  }
  func.func @transform_9(%arg0: i32) -> (i32, i32) {
    %c0_i32 = arith.constant 0 : i32
    %c0_i32_0 = arith.constant 0 : i32
    return %arg0, %c0_i32 : i32, i32
  }
}

</mosaic_0001>

<bundles_post_ra>
// kernel: tpu_custom_call.1
= control target key start
LH: loop header
LB: loop body
LE: loop exit
PB: predicated region body
PF: predicated region fallthrough
CT: control target
= control target key end

     0   :  { %s1394_s0 = inlined_call_operand.vmem [shape: bf16[16,16], index: 0, kind: input, shape index: {}]   ;;  %s1395_s1 = inlined_call_operand.vmem [shape: s32[16,1], index: 1, kind: input, shape index: {}]   ;;  %s1396_s2 = inlined_call_operand.vmem [shape: bf16[16,128], index: 2, kind: input, shape index: {}]   ;;  %s1397_s3 = inlined_call_operand.vmem [shape: bf16[8,128], index: 3, kind: input, shape index: {}]   ;;  %s1398_s4 = inlined_call_operand.vmem [shape: f32[1,128], index: 4, kind: input, shape index: {}]   ;;  %s1399_s5 = inlined_call_operand.hbm [shape: bf16[128,128], index: 5, kind: input, shape index: {}]   ;;  %s1400_s6 = inlined_call_operand.vmem [shape: f32[1,128], index: 6, kind: input, shape index: {}]   ;;  %s1401_s7 = inlined_call_operand.hbm [shape: bf16[128,128], index: 7, kind: input, shape index: {}]   ;;  %s1402_s8 = inlined_call_operand.vmem [shape: f32[1,128], index: 8, kind: input, shape index: {}]   ;;  %s1403_s9 = inlined_call_operand.hbm [shape: f32[16,128], index: 9, kind: output, shape index: {}]  }
   0x1   :  { %1405 = sst [smem:[#allocation11_spill]] %s1399_s5 }
   0x2   :  { %14 = vsyncpa [#allocation3], 0 }
   0x3   :  { %15 = vsyncpa [#allocation6], 0 }
   0x4   :  { %16 = vsyncpa [#allocation4], 0 }
   0x5   :  { %18 = vsyncpa [#allocation4 + $0x1], 0  ;;  %s1209_s30 = smov 0   ;;  %s1211_s10 = smov 0  }
   0x6   :  { %s1213_s11 = smov 0   ;;  %s1215_s12 = smov 0  }
   0x7 LB: > { %s1230_s13 = sadd.s32 4294967295, %s1149_s12   ;;  %s830_s14 = sadd.s32 4294967294, %s1149_s12   ;;  %s1149_s12 = sphi %s1215_s12, %s1419_s12   ;;  %s1145_s11 = sphi %s1213_s11, %s1418_s11   ;;  %s1141_s10 = sphi %s1211_s10, %s1417_s10   ;;  %s1137_s30 = sphi %s1209_s30, %s1416_s30  }
   0x8   : > { %s1234_s15 = sadd.s32 1, %s1149_s12   ;;  %s230_s16 = sadd.s32 1, %s1145_s11 }
   0x9   : > { %s227_s17 = ssub.s32 %s1149_s12, %s1234_s15  ;;  %p240_p0 = scmp.ne.s32.totalorder %s1145_s11, %s1141_s10 }
   0xa   : > { %p228_p1 = scmp.eq.s32.totalorder %s227_s17, 0  ;;  %p241_p2 = scmp.eq.s32.totalorder %s1230_s13, 1 }
   0xb   : > { %p246_p3 = scmp.ne.s32.totalorder %s1141_s10, %s1137_s30  ;;  %p247_p4 = scmp.eq.s32.totalorder %s830_s14, 1 }
   0xc   : > { %s1245_s18 = scalar_select %p228_p1, %s1145_s11, %s230_s16  }
   0xd   : > { %p1247_p5 = por %p241_p2, %p240_p0  ;;  %p1251_p6 = por %p247_p4, %p246_p3 }
   0xe   : > { %p831_p7 = scmp.ge.s32.totalorder %s1149_s12, 1  ;;  %p254_p8 = scmp.lt.s32.totalorder %s1149_s12, 3 }
   0xf   : > { %s1407_s20 = scalar_select %p1251_p6, 1, 0 }
  0x10   : > { %p1404_p9 = scmp.eq.s32.totalorder %s1230_s13, 0  ;;  %p1258_p10 = pnand %p831_p7, %p254_p8 }
  0x11   : > { %s1151_s22 = smov [#allocation2]   ;;  %s1152_s25 = smov [#allocation5]  }
  0x12   : > { %s275_s23 = sshll.u32 %s1151_s22, 4  ;;  %p952_p11 = pneg %p1258_p10  ;;  %s276_s23 = int_to_ptr.vmem [resolvable:$true] %s275_s23 }
  0x13   : > { %s291_s26 = sshll.u32 %s1152_s25, 4  ;;  %s1040_s27 = scalar_lea.vmem %s276_s23, 1024  ;;  %s292_s26 = int_to_ptr.vmem [resolvable:$true] %s291_s26 }
  0x14   : > { %p1266_p12 = pnand %p1404_p9, %p952_p11  ;;  %p1041_p0 = scmp.ne.s32.totalorder %s276_s23, %s1040_s27 }
  0x15   : > { %p1048_p3 = scmp.lt.s32.totalorder %s276_s23, %s276_s23  ;;  %p1049_p4 = scmp.lt.s32.totalorder %s1040_s27, %s1040_s27 }
  0x16   : > { %p1031_p13 = pneg %p1266_p12 }
  0x17   : > { %p1050_p7 = por %p1049_p4, %p1048_p3 }
  0x18   : > { %p1043_p1 = pnand %p1041_p0, %p1031_p13 }
  0x1a   : > { %p1044_p2 = pneg %p1043_p1 }
  0x1c   : > { %p1051_p8 = pnand %p1050_p7, %p1044_p2 }
  0x1e   : > { %1054 = shalt.err (!%p1051_p8)
}
  0x1f   : > { %s1153_s28 = smov 64   ;;  %s1154_s29 = smov 4  }
  0x20   : > { %s1410_s5 = sld [smem:[#allocation11_spill]]  ;;  %s1066_s17 = scalar_lea.vmem %s292_s26, 1024 }
  0x21   : > { %p1067_p11 = scmp.ne.s32.totalorder %s292_s26, %s1066_s17  ;;  %p1074_p9 = scmp.lt.s32.totalorder %s292_s26, %s292_s26 }
  0x22   : > { %p1075_p6 = scmp.lt.s32.totalorder %s1066_s17, %s1066_s17 }
  0x23   : > { %p1069_p0 = pnand %p1067_p11, %p1031_p13 }
  0x24   : > { %p1076_p3 = por %p1075_p6, %p1074_p9 }
  0x25   : > { %p1070_p1 = pneg %p1069_p0 }
  0x26   : > { %955 = dma.hbm_to_vmem [thread:$0]  (!%p1266_p12), %s1410_s5, 1024, %s276_s23, [#allocation3], %s1153_s28, %s1153_s28, %s1154_s29  }
  0x27   : > { %p1077_p2 = pnand %p1076_p3, %p1070_p1 }
  0x29   : > { %1080 = shalt.err (!%p1077_p2)
}
  0x2a   : > { %958 = dma.hbm_to_vmem [thread:$0]  (!%p1266_p12), %s1401_s7, 1024, %s292_s26, [#allocation6], %s1153_s28, %s1153_s28, %s1154_s29  }
  0x2b   : > { %324 = sbr.rel (%p1258_p10) target bundleno = 820 (0x334), region = 56  ;;  %p1411_p4 = scmp.eq.s32.totalorder (!%p1258_p10), %s1230_s13, 0 }
  0x30   : > { %1124 = dma.done.wait (%p1411_p4), [#allocation3], 1024   ;;  %p1412_p13 = pmov %p1411_p4 }
  0x31   : > { %p1413_p7 = pmov %p1411_p4 }
  0x32   : > { %1126 = vsyncadd (%p1412_p13), [#allocation3], 4294966272 }
  0x33   : > { %1128 = dma.done.wait (%p1413_p7), [#allocation6], 1024   ;;  %p1414_p6 = pmov %p1411_p4 }
  0x34   : > { %p367_p9 = scmp.lt.s32.totalorder %s1230_s13, 1  ;;  %v1155_v0 = vmov 0   ;;  %v1156_v1 = vmov 0.0   ;;  %vm1157_vm0 = vmmov 0   ;;  %vm394_vm1 = vcmask 1043456   ;;  %v1008_v3 = vld [vmem:[%s1396_s2] sm:$0xff]  }
  0x35   : > { %1130 = vsyncadd (%p1414_p6), [#allocation6], 4294966272  ;;  %1007 = vset.pattern.permute.xlu0 %v1155_v0  ;;  %896 = vmatprep.subr.bf16.mxu1 %v1156_v1  ;;  %v389_v5 = vld [vmem:[%s1397_s3] sm:$0xf]  ;;  %vm444_vm2 = vcmask 130048   ;;  %v377_v7 = vlaneseq  ;;  %vm390_vm4 = vcmask 64512  }
  0x36   : > { %s368_s21 = scalar_select %p367_p9, %s1230_s13, 1  ;;  %898 = vmatprep.mubr.msk.bf16.mxu1 %vm1157_vm0, %v1156_v1  ;;  %890 = vmatprep.subr.bf16.mxu0 %v1156_v1  ;;  %v396_v6 = vsel %vm394_vm1, %v389_v5, 0  ;;  %v1009_v11 = vld [vmem:[#allocation2 + $0x38] sm:$0xff]   ;;  %v1010_v13 = vld [vmem:[#allocation2 + $0x30] sm:$0xff]   ;;  %v1011_v14 = vld [vmem:[#allocation2 + $0x28] sm:$0xff]  }
  0x37   : > { %892 = vmatprep.mubr.msk.bf16.mxu0 %vm1157_vm0, %v1156_v1  ;;  %897 = vmatpush3.bf16.msra.mxu1 %v1008_v3  ;;  %v378_v8 = vand.u32 127, %v377_v7  ;;  %v1012_v15 = vld [vmem:[#allocation2 + $0x20] sm:$0xff]   ;;  %v1013_v16 = vld [vmem:[#allocation2 + $0x18] sm:$0xff]   ;;  %v1014_v19 = vld [vmem:[#allocation2 + $0x10] sm:$0xff]   ;;  %s364_s26 = sand.u32 1, %s1141_s10   ;;  %s865_s14 = sshll.u32 %s1230_s13, 7 }
  0x38   : > { %s840_s23 = sshll.u32 %s368_s21, 3  ;;  %s839_s24 = sshll.u32 %s368_s21, 2  ;;  %891 = vmatpush3.bf16.msra.mxu0 %v396_v6  ;;  %922 = vmatprep.subr.bf16.mxu1 %v1156_v1  ;;  %v1015_v22 = vld [vmem:[#allocation2 + $0x8] sm:$0xff]   ;;  %v1016_v23 = vld [vmem:[#allocation2] sm:$0xff]   ;;  %v1017_v24 = vld [vmem:[#allocation5 + $0x38] sm:$0xff]  }
  0x39   : > { %s374_s28 = scalar_lea.vmem %s1395_s1, %s840_s23  ;;  %s370_s16 = scalar_lea.vmem %s1394_s0, %s839_s24  ;;  %902 = vmatprep.subr.bf16.mxu0 %v1156_v1  ;;  %v1018_v25 = vld [vmem:[#allocation5 + $0x30] sm:$0xff]   ;;  %v1019_v26 = vld [vmem:[#allocation5 + $0x28] sm:$0xff]   ;;  %v845_v28 = vld [vmem:[%s1398_s4] ss:$0 sm:$0xff] }
  0x3a   : > { %v376_v2 = vld [vmem:[%s374_s28] sm:$0xff]  ;;  %v1021_v37 = vld [vmem:[#allocation5 + $0x18] sm:$0xff]   ;;  %v1022_v38 = vld [vmem:[#allocation5 + $0x10] sm:$0xff]   ;;  %s838_s27 = sshll.u32 %s364_s26, 3  ;;  %s1353_s5 = scalar_lea.hbm %s1403_s9, %s865_s14 }
  0x3b   : > { %380 = vperm.xlu0 %1007, %v376_v2   ;;  %v386_v4 = vld [vmem:[%s370_s16] sm:$0xf]  ;;  %v1023_v39 = vld [vmem:[#allocation5 + $0x8] sm:$0xff]   ;;  %s366_s16 = scalar_lea.vmem [#allocation7], %s838_s27  ;;  %s724_s21 = scalar_lea.sflag [#allocation4], %s364_s26 }
  0x3c   : > { %899 = vmatmul.mubr.msk.bf16.vlgmr.msra.gmra.mxu1 %vm444_vm2, %v386_v4  ;;  %v1020_v36 = vld [vmem:[#allocation5 + $0x20] sm:$0xff]   ;;  %s737_s17 = sshll.u32 %s366_s16, 4  ;;  %s1158_s13 = smov [#allocation7]   ;;  %s1355_s17 = int_to_ptr.vmem [resolvable:$true] %s737_s17 }
  0x3d   : > { %938 = vmatprep.mubr.msk.bf16.mxu1 %vm1157_vm0, %v1156_v1  ;;  %923 = vmatpush3.bf16.msra.mxu1 %v1017_v24  ;;  %v1024_v40 = vld [vmem:[#allocation5] sm:$0xff]   ;;  %s1081_s23 = scalar_lea.vmem %s1355_s17, 128  ;;  %s1085_s24 = sshll.u32 %s1158_s13, 4  ;;  %s1086_s24 = int_to_ptr.vmem [resolvable:$false] %s1085_s24 }
  0x3e   : > { %924 = vmatprep.subr.bf16.mxu1 %v1156_v1  ;;  %v846_v41 = vld [vmem:[%s1400_s6] ss:$0 sm:$0xff]  ;;  %p1082_p10 = scmp.ne.s32.totalorder %s1355_s17, %s1081_s23  ;;  %s1087_s27 = scalar_lea.vmem %s1086_s24, 256 }
  0x3f   : > { %v855_v49 = vld [vmem:[%s1402_s8] ss:$0 sm:$0xff]  ;;  %p1088_p11 = scmp.lt.s32.totalorder %s1355_s17, %s1086_s24  ;;  %p1089_p0 = scmp.lt.s32.totalorder %s1087_s27, %s1081_s23 }
  0x40   : > { %p1083_p12 = pnand %p1082_p10, %p1247_p5 }
  0x41   : > { %925 = vmatpush3.bf16.msra.mxu1 %v1018_v25  ;;  %p1090_p1 = por %p1089_p0, %p1088_p11 }
  0x42   : > { %926 = vmatprep.subr.bf16.mxu1 %v1156_v1  ;;  %p1084_p8 = pneg %p1083_p12 }
  0x44   : > { %p1091_p3 = pnand %p1090_p1, %p1084_p8 }
  0x45   : > { %927 = vmatpush3.bf16.msra.mxu1 %v1019_v26 }
  0x46   : > { %928 = vmatprep.subr.bf16.mxu1 %v1156_v1 }
  0x49   : > { %929 = vmatpush3.bf16.msra.mxu1 %v1020_v36 }
  0x4a   : > { %930 = vmatprep.subr.bf16.mxu1 %v1156_v1 }
  0x4d   : > { %931 = vmatpush3.bf16.msra.mxu1 %v1021_v37 }
  0x4e   : > { %932 = vmatprep.subr.bf16.mxu1 %v1156_v1 }
  0x51   : > { %933 = vmatpush3.bf16.msra.mxu1 %v1022_v38 }
  0x52   : > { %934 = vmatprep.subr.bf16.mxu1 %v1156_v1 }
  0x55   : > { %935 = vmatpush3.bf16.msra.mxu1 %v1023_v39 }
  0x56   : > { %936 = vmatprep.subr.bf16.mxu1 %v1156_v1 }
  0x59   : > { %937 = vmatpush3.bf16.msra.mxu1 %v1024_v40 }
  0xb6   : > { %v381_v9 = vpop.permute.xlu0 %380 }
  0xb7   : > { %vm382_vm3 = vcmp.eq.s32.totalorder %v378_v8, %v381_v9 }
  0xb8   : > { %v841_v10 = vsel %vm382_vm3, 1.0, %v1156_v1 }
  0xb9   : > { %v385_v12 = vpack.c.bf16 %v841_v10, %v841_v10 }
  0xbb   : > { %893 = vmatmul.mubr.msk.bf16.vlgmr.msra.gmra.mxu0 %vm390_vm4, %v385_v12 }
  0xbc   : > { %903 = vmatpush3.bf16.msra.mxu0 %v1009_v11  ;;  %918 = vmatprep.mubr.msk.bf16.mxu0 %vm1157_vm0, %v1156_v1 }
  0xbd   : > { %904 = vmatprep.subr.bf16.mxu0 %v1156_v1 }
  0xc0   : > { %905 = vmatpush3.bf16.msra.mxu0 %v1010_v13 }
  0xc1   : > { %906 = vmatprep.subr.bf16.mxu0 %v1156_v1 }
  0xc4   : > { %907 = vmatpush3.bf16.msra.mxu0 %v1011_v14 }
  0xc5   : > { %908 = vmatprep.subr.bf16.mxu0 %v1156_v1 }
  0xc8   : > { %909 = vmatpush3.bf16.msra.mxu0 %v1012_v15 }
  0xc9   : > { %910 = vmatprep.subr.bf16.mxu0 %v1156_v1 }
  0xcc   : > { %911 = vmatpush3.bf16.msra.mxu0 %v1013_v16 }
  0xcd   : > { %912 = vmatprep.subr.bf16.mxu0 %v1156_v1 }
  0xd0   : > { %913 = vmatpush3.bf16.msra.mxu0 %v1014_v19 }
  0xd1   : > { %914 = vmatprep.subr.bf16.mxu0 %v1156_v1 }
  0xd4   : > { %915 = vmatpush3.bf16.msra.mxu0 %v1015_v22 }
  0xd5   : > { %916 = vmatprep.subr.bf16.mxu0 %v1156_v1 }
  0xd8   : > { %917 = vmatpush3.bf16.msra.mxu0 %v1016_v23 }
  0xfc   : > { %v482_v17 = vpop.f32.mrf.mxu1 }
  0xfe   : > { %v900_v18 = vpop.f32.mrf.mxu1 }
 0x100   : > { %v485_v20 = vpop.f32.mrf.mxu1 }
 0x102   : > { %v901_v21 = vpop.f32.mrf.mxu1 }
 0x17b   : > { %v432_v27 = vpop.f32.mrf.mxu0 }
 0x17c   : > { %v483_v29 = vadd.f32 %v482_v17, %v432_v27 }
 0x17d   : > { %v894_v30 = vpop.f32.mrf.mxu0 }
 0x17e   : > { %v495_v31 = vadd.f32 %v845_v28, %v483_v29 }
 0x17f   : > { %v435_v32 = vpop.f32.mrf.mxu0 }
 0x180   : > { %1025 = vtanh.f32 %v495_v31 }
 0x181   : > { %v895_v33 = vpop.f32.mrf.mxu0 }
 0x18d   : > { %v1026_v34 = vpop.eup %1025 }
 0x18e   : > { %v497_v35 = vpack.c.bf16 %v1026_v34, %v1026_v34 }
 0x190   : > { %919 = vmatmul.mubr.bf16.vlgmr.msra.gmra.mxu0 %v497_v35 }
 0x250   : > { %v603_v42 = vpop.f32.mrf.mxu0 }
 0x251   : > { %v604_v43 = vadd.f32 %v846_v41, %v603_v42 }
 0x252   : > { %v920_v44 = vpop.f32.mrf.mxu0 }
 0x253   : > { %1027 = vtanh.f32 %v604_v43 }
 0x254   : > { %v606_v45 = vpop.f32.mrf.mxu0 }
 0x256   : > { %v921_v46 = vpop.f32.mrf.mxu0 }
 0x260   : > { %v1028_v47 = vpop.eup %1027 }
 0x261   : > { %v610_v48 = vpack.c.bf16 %v1028_v47, %v1028_v47 }
 0x263   : > { %939 = vmatmul.mubr.bf16.vlgmr.msra.gmra.mxu1 %v610_v48 }
 0x323   : > { %v716_v50 = vpop.f32.mrf.mxu1 }
 0x324   : > { %v717_v51 = vadd.f32 %v855_v49, %v716_v50 }
 0x325   : > { %v940_v52 = vpop.f32.mrf.mxu1 }
 0x326   : > { %722 = vst [vmem:[%s366_s16] sm:$0xff] %v717_v51 }
 0x327   : > { %v719_v53 = vpop.f32.mrf.mxu1 }
 0x328   : > { %1094 = shalt.err (!%p1091_p3)
}
 0x329   : > { %s1095_s28 = scalar_lea.hbm %s1353_s5, 128  ;;  %s1099_s14 = scalar_lea.hbm %s1403_s9, 256 }
 0x32a   : > { %p1096_p2 = scmp.ne.s32.totalorder %s1353_s5, %s1095_s28  ;;  %p1100_p7 = scmp.lt.s32.totalorder %s1353_s5, %s1403_s9 }
 0x32b   : > { %p1101_p6 = scmp.lt.s32.totalorder %s1099_s14, %s1095_s28 }
 0x32c   : > { %p1097_p4 = pnand %p1096_p2, %p1247_p5 }
 0x32d   : > { %p1102_p9 = por %p1101_p6, %p1100_p7 }
 0x32e   : > { %p1098_p13 = pneg %p1097_p4 }
 0x330   : > { %p1103_p10 = pnand %p1102_p9, %p1098_p13 }
 0x332   : > { %1106 = shalt.err (!%p1103_p10)
}
 0x333   : > { %950 = dma.vmem_to_hbm [thread:$0]  (%p1247_p5), %s1355_s17, 128, %s1353_s5, %s724_s21   ;;  %v941_v54 = vpop.f32.mrf.mxu1 }
 0x334 PF: > { %p967_p12 = scmp.ge.s32.totalorder %s1149_s12, 2  ;;  %s749_s25 = sand.u32 1, %s1137_s30  }
 0x335   : > { %p1415_p8 = scmp.ne.s32.totalorder %s1407_s20, 0  ;;  %s750_s23 = scalar_lea.sflag [#allocation4], %s749_s25 }
 0x337   : > { %p960_p11 = pnand %p967_p12, %p1415_p8 }
 0x339   : > { %p961_p0 = pneg %p960_p11 }
 0x33b   : > { %1132 = dma.done.wait (%p961_p0), %s750_s23, 128  }
 0x33c   : > { %1134 = vsyncadd (%p961_p0), %s750_s23, 4294967168  ;;  %p21_p1 = scmp.ge.s32.totalorder %s1234_s15, 4   ;;  %s1416_s30 = smov %s1141_s10 }
 0x33d   : > { %s1417_s10 = smov %s1145_s11  ;;  %s1418_s11 = smov %s1245_s18 }
 0x33e   : > { %s1419_s12 = smov %s1234_s15  ;;  %23 = sbr.rel (!%p21_p1) target bundleno = 7 (0x7), region = 103 }
 0x343   :  { %755 = vsyncpa [#allocation3], 1 }
 0x344   :  { %757 = vsyncpa [#allocation3 + $0x1], 1 }
 0x345   :  { %758 = vsyncpa [#allocation6], 1 }
 0x346   :  { %759 = vsyncpa [#allocation4], 1 }
 0x347   :  { %761 = vsyncpa [#allocation4 + $0x1], 1 }

// kernel: tpu_custom_call.1
= control target key start
LH: loop header
LB: loop body
LE: loop exit
PB: predicated region body
PF: predicated region fallthrough
CT: control target
= control target key end

     0   :  { %s1394_s0 = inlined_call_operand.vmem [shape: bf16[16,16], index: 0, kind: input, shape index: {}]   ;;  %s1395_s1 = inlined_call_operand.vmem [shape: s32[16,1], index: 1, kind: input, shape index: {}]   ;;  %s1396_s2 = inlined_call_operand.vmem [shape: bf16[16,128], index: 2, kind: input, shape index: {}]   ;;  %s1397_s3 = inlined_call_operand.vmem [shape: bf16[8,128], index: 3, kind: input, shape index: {}]   ;;  %s1398_s4 = inlined_call_operand.vmem [shape: f32[1,128], index: 4, kind: input, shape index: {}]   ;;  %s1399_s5 = inlined_call_operand.hbm [shape: bf16[128,128], index: 5, kind: input, shape index: {}]   ;;  %s1400_s6 = inlined_call_operand.vmem [shape: f32[1,128], index: 6, kind: input, shape index: {}]   ;;  %s1401_s7 = inlined_call_operand.hbm [shape: bf16[128,128], index: 7, kind: input, shape index: {}]   ;;  %s1402_s8 = inlined_call_operand.vmem [shape: f32[1,128], index: 8, kind: input, shape index: {}]   ;;  %s1403_s9 = inlined_call_operand.hbm [shape: f32[16,128], index: 9, kind: output, shape index: {}]  }
   0x1   :  { %1405 = sst [smem:[#allocation11_spill]] %s1399_s5 }
   0x2   :  { %14 = vsyncpa [#allocation3], 0 }
   0x3   :  { %15 = vsyncpa [#allocation6], 0 }
   0x4   :  { %16 = vsyncpa [#allocation4], 0 }
   0x5   :  { %18 = vsyncpa [#allocation4 + $0x1], 0  ;;  %s1209_s30 = smov 0   ;;  %s1211_s10 = smov 0  }
   0x6   :  { %s1213_s11 = smov 0   ;;  %s1215_s12 = smov 0  }
   0x7 LB: > { %s1230_s13 = sadd.s32 4294967295, %s1149_s12   ;;  %s830_s14 = sadd.s32 4294967294, %s1149_s12   ;;  %s1149_s12 = sphi %s1215_s12, %s1419_s12   ;;  %s1145_s11 = sphi %s1213_s11, %s1418_s11   ;;  %s1141_s10 = sphi %s1211_s10, %s1417_s10   ;;  %s1137_s30 = sphi %s1209_s30, %s1416_s30  }
   0x8   : > { %s1234_s15 = sadd.s32 1, %s1149_s12   ;;  %s230_s16 = sadd.s32 1, %s1145_s11 }
   0x9   : > { %s227_s17 = ssub.s32 %s1149_s12, %s1234_s15  ;;  %p240_p0 = scmp.ne.s32.totalorder %s1145_s11, %s1141_s10 }
   0xa   : > { %p228_p1 = scmp.eq.s32.totalorder %s227_s17, 0  ;;  %p241_p2 = scmp.eq.s32.totalorder %s1230_s13, 1 }
   0xb   : > { %p246_p3 = scmp.ne.s32.totalorder %s1141_s10, %s1137_s30  ;;  %p247_p4 = scmp.eq.s32.totalorder %s830_s14, 1 }
   0xc   : > { %s1245_s18 = scalar_select %p228_p1, %s1145_s11, %s230_s16  }
   0xd   : > { %p1247_p5 = por %p241_p2, %p240_p0  ;;  %p1251_p6 = por %p247_p4, %p246_p3 }
   0xe   : > { %p831_p7 = scmp.ge.s32.totalorder %s1149_s12, 1  ;;  %p254_p8 = scmp.lt.s32.totalorder %s1149_s12, 3 }
   0xf   : > { %s1407_s20 = scalar_select %p1251_p6, 1, 0 }
  0x10   : > { %p1404_p9 = scmp.eq.s32.totalorder %s1230_s13, 0  ;;  %p1258_p10 = pnand %p831_p7, %p254_p8 }
  0x11   : > { %s1151_s22 = smov [#allocation2]   ;;  %s1152_s25 = smov [#allocation5]  }
  0x12   : > { %s275_s23 = sshll.u32 %s1151_s22, 4  ;;  %p952_p11 = pneg %p1258_p10  ;;  %s276_s23 = int_to_ptr.vmem [resolvable:$true] %s275_s23 }
  0x13   : > { %s291_s26 = sshll.u32 %s1152_s25, 4  ;;  %s1040_s27 = scalar_lea.vmem %s276_s23, 1024  ;;  %s292_s26 = int_to_ptr.vmem [resolvable:$true] %s291_s26 }
  0x14   : > { %p1266_p12 = pnand %p1404_p9, %p952_p11  ;;  %p1041_p0 = scmp.ne.s32.totalorder %s276_s23, %s1040_s27 }
  0x15   : > { %p1048_p3 = scmp.lt.s32.totalorder %s276_s23, %s276_s23  ;;  %p1049_p4 = scmp.lt.s32.totalorder %s1040_s27, %s1040_s27 }
  0x16   : > { %p1031_p13 = pneg %p1266_p12 }
  0x17   : > { %p1050_p7 = por %p1049_p4, %p1048_p3 }
  0x18   : > { %p1043_p1 = pnand %p1041_p0, %p1031_p13 }
  0x1a   : > { %p1044_p2 = pneg %p1043_p1 }
  0x1c   : > { %p1051_p8 = pnand %p1050_p7, %p1044_p2 }
  0x1e   : > { %1054 = shalt.err (!%p1051_p8)
}
  0x1f   : > { %s1153_s28 = smov 64   ;;  %s1154_s29 = smov 4  }
  0x20   : > { %s1410_s5 = sld [smem:[#allocation11_spill]]  ;;  %s1066_s17 = scalar_lea.vmem %s292_s26, 1024 }
  0x21   : > { %p1067_p11 = scmp.ne.s32.totalorder %s292_s26, %s1066_s17  ;;  %p1074_p9 = scmp.lt.s32.totalorder %s292_s26, %s292_s26 }
  0x22   : > { %p1075_p6 = scmp.lt.s32.totalorder %s1066_s17, %s1066_s17 }
  0x23   : > { %p1069_p0 = pnand %p1067_p11, %p1031_p13 }
  0x24   : > { %p1076_p3 = por %p1075_p6, %p1074_p9 }
  0x25   : > { %p1070_p1 = pneg %p1069_p0 }
  0x26   : > { %955 = dma.hbm_to_vmem [thread:$0]  (!%p1266_p12), %s1410_s5, 1024, %s276_s23, [#allocation3], %s1153_s28, %s1153_s28, %s1154_s29  }
  0x27   : > { %p1077_p2 = pnand %p1076_p3, %p1070_p1 }
  0x29   : > { %1080 = shalt.err (!%p1077_p2)
}
  0x2a   : > { %958 = dma.hbm_to_vmem [thread:$0]  (!%p1266_p12), %s1401_s7, 1024, %s292_s26, [#allocation6], %s1153_s28, %s1153_s28, %s1154_s29  }
  0x2b   : > { %324 = sbr.rel (%p1258_p10) target bundleno = 820 (0x334), region = 56  ;;  %p1411_p4 = scmp.eq.s32.totalorder (!%p1258_p10), %s1230_s13, 0 }
  0x30   : > { %1124 = dma.done.wait (%p1411_p4), [#allocation3], 1024   ;;  %p1412_p13 = pmov %p1411_p4 }
  0x31   : > { %p1413_p7 = pmov %p1411_p4 }
  0x32   : > { %1126 = vsyncadd (%p1412_p13), [#allocation3], 4294966272 }
  0x33   : > { %1128 = dma.done.wait (%p1413_p7), [#allocation6], 1024   ;;  %p1414_p6 = pmov %p1411_p4 }
  0x34   : > { %p367_p9 = scmp.lt.s32.totalorder %s1230_s13, 1  ;;  %v1155_v0 = vmov 0   ;;  %v1156_v1 = vmov 0.0   ;;  %vm1157_vm0 = vmmov 0   ;;  %vm394_vm1 = vcmask 1043456   ;;  %v1008_v3 = vld [vmem:[%s1396_s2] sm:$0xff]  }
  0x35   : > { %1130 = vsyncadd (%p1414_p6), [#allocation6], 4294966272  ;;  %1007 = vset.pattern.permute.xlu0 %v1155_v0  ;;  %896 = vmatprep.subr.bf16.mxu1 %v1156_v1  ;;  %v389_v5 = vld [vmem:[%s1397_s3] sm:$0xf]  ;;  %vm444_vm2 = vcmask 130048   ;;  %v377_v7 = vlaneseq  ;;  %vm390_vm4 = vcmask 64512  }
  0x36   : > { %s368_s21 = scalar_select %p367_p9, %s1230_s13, 1  ;;  %898 = vmatprep.mubr.msk.bf16.mxu1 %vm1157_vm0, %v1156_v1  ;;  %890 = vmatprep.subr.bf16.mxu0 %v1156_v1  ;;  %v396_v6 = vsel %vm394_vm1, %v389_v5, 0  ;;  %v1009_v11 = vld [vmem:[#allocation2 + $0x38] sm:$0xff]   ;;  %v1010_v13 = vld [vmem:[#allocation2 + $0x30] sm:$0xff]   ;;  %v1011_v14 = vld [vmem:[#allocation2 + $0x28] sm:$0xff]  }
  0x37   : > { %892 = vmatprep.mubr.msk.bf16.mxu0 %vm1157_vm0, %v1156_v1  ;;  %897 = vmatpush3.bf16.msra.mxu1 %v1008_v3  ;;  %v378_v8 = vand.u32 127, %v377_v7  ;;  %v1012_v15 = vld [vmem:[#allocation2 + $0x20] sm:$0xff]   ;;  %v1013_v16 = vld [vmem:[#allocation2 + $0x18] sm:$0xff]   ;;  %v1014_v19 = vld [vmem:[#allocation2 + $0x10] sm:$0xff]   ;;  %s364_s26 = sand.u32 1, %s1141_s10   ;;  %s865_s14 = sshll.u32 %s1230_s13, 7 }
  0x38   : > { %s840_s23 = sshll.u32 %s368_s21, 3  ;;  %s839_s24 = sshll.u32 %s368_s21, 2  ;;  %891 = vmatpush3.bf16.msra.mxu0 %v396_v6  ;;  %922 = vmatprep.subr.bf16.mxu1 %v1156_v1  ;;  %v1015_v22 = vld [vmem:[#allocation2 + $0x8] sm:$0xff]   ;;  %v1016_v23 = vld [vmem:[#allocation2] sm:$0xff]   ;;  %v1017_v24 = vld [vmem:[#allocation5 + $0x38] sm:$0xff]  }
  0x39   : > { %s374_s28 = scalar_lea.vmem %s1395_s1, %s840_s23  ;;  %s370_s16 = scalar_lea.vmem %s1394_s0, %s839_s24  ;;  %902 = vmatprep.subr.bf16.mxu0 %v1156_v1  ;;  %v1018_v25 = vld [vmem:[#allocation5 + $0x30] sm:$0xff]   ;;  %v1019_v26 = vld [vmem:[#allocation5 + $0x28] sm:$0xff]   ;;  %v845_v28 = vld [vmem:[%s1398_s4] ss:$0 sm:$0xff] }
  0x3a   : > { %v376_v2 = vld [vmem:[%s374_s28] sm:$0xff]  ;;  %v1021_v37 = vld [vmem:[#allocation5 + $0x18] sm:$0xff]   ;;  %v1022_v38 = vld [vmem:[#allocation5 + $0x10] sm:$0xff]   ;;  %s838_s27 = sshll.u32 %s364_s26, 3  ;;  %s1353_s5 = scalar_lea.hbm %s1403_s9, %s865_s14 }
  0x3b   : > { %380 = vperm.xlu0 %1007, %v376_v2   ;;  %v386_v4 = vld [vmem:[%s370_s16] sm:$0xf]  ;;  %v1023_v39 = vld [vmem:[#allocation5 + $0x8] sm:$0xff]   ;;  %s366_s16 = scalar_lea.vmem [#allocation7], %s838_s27  ;;  %s724_s21 = scalar_lea.sflag [#allocation4], %s364_s26 }
  0x3c   : > { %899 = vmatmul.mubr.msk.bf16.vlgmr.msra.gmra.mxu1 %vm444_vm2, %v386_v4  ;;  %v1020_v36 = vld [vmem:[#allocation5 + $0x20] sm:$0xff]   ;;  %s737_s17 = sshll.u32 %s366_s16, 4  ;;  %s1158_s13 = smov [#allocation7]   ;;  %s1355_s17 = int_to_ptr.vmem [resolvable:$true] %s737_s17 }
  0x3d   : > { %938 = vmatprep.mubr.msk.bf16.mxu1 %vm1157_vm0, %v1156_v1  ;;  %923 = vmatpush3.bf16.msra.mxu1 %v1017_v24  ;;  %v1024_v40 = vld [vmem:[#allocation5] sm:$0xff]   ;;  %s1081_s23 = scalar_lea.vmem %s1355_s17, 128  ;;  %s1085_s24 = sshll.u32 %s1158_s13, 4  ;;  %s1086_s24 = int_to_ptr.vmem [resolvable:$false] %s1085_s24 }
  0x3e   : > { %924 = vmatprep.subr.bf16.mxu1 %v1156_v1  ;;  %v846_v41 = vld [vmem:[%s1400_s6] ss:$0 sm:$0xff]  ;;  %p1082_p10 = scmp.ne.s32.totalorder %s1355_s17, %s1081_s23  ;;  %s1087_s27 = scalar_lea.vmem %s1086_s24, 256 }
  0x3f   : > { %v855_v49 = vld [vmem:[%s1402_s8] ss:$0 sm:$0xff]  ;;  %p1088_p11 = scmp.lt.s32.totalorder %s1355_s17, %s1086_s24  ;;  %p1089_p0 = scmp.lt.s32.totalorder %s1087_s27, %s1081_s23 }
  0x40   : > { %p1083_p12 = pnand %p1082_p10, %p1247_p5 }
  0x41   : > { %925 = vmatpush3.bf16.msra.mxu1 %v1018_v25  ;;  %p1090_p1 = por %p1089_p0, %p1088_p11 }
  0x42   : > { %926 = vmatprep.subr.bf16.mxu1 %v1156_v1  ;;  %p1084_p8 = pneg %p1083_p12 }
  0x44   : > { %p1091_p3 = pnand %p1090_p1, %p1084_p8 }
  0x45   : > { %927 = vmatpush3.bf16.msra.mxu1 %v1019_v26 }
  0x46   : > { %928 = vmatprep.subr.bf16.mxu1 %v1156_v1 }
  0x49   : > { %929 = vmatpush3.bf16.msra.mxu1 %v1020_v36 }
  0x4a   : > { %930 = vmatprep.subr.bf16.mxu1 %v1156_v1 }
  0x4d   : > { %931 = vmatpush3.bf16.msra.mxu1 %v1021_v37 }
  0x4e   : > { %932 = vmatprep.subr.bf16.mxu1 %v1156_v1 }
  0x51   : > { %933 = vmatpush3.bf16.msra.mxu1 %v1022_v38 }
  0x52   : > { %934 = vmatprep.subr.bf16.mxu1 %v1156_v1 }
  0x55   : > { %935 = vmatpush3.bf16.msra.mxu1 %v1023_v39 }
  0x56   : > { %936 = vmatprep.subr.bf16.mxu1 %v1156_v1 }
  0x59   : > { %937 = vmatpush3.bf16.msra.mxu1 %v1024_v40 }
  0xb6   : > { %v381_v9 = vpop.permute.xlu0 %380 }
  0xb7   : > { %vm382_vm3 = vcmp.eq.s32.totalorder %v378_v8, %v381_v9 }
  0xb8   : > { %v841_v10 = vsel %vm382_vm3, 1.0, %v1156_v1 }
  0xb9   : > { %v385_v12 = vpack.c.bf16 %v841_v10, %v841_v10 }
  0xbb   : > { %893 = vmatmul.mubr.msk.bf16.vlgmr.msra.gmra.mxu0 %vm390_vm4, %v385_v12 }
  0xbc   : > { %903 = vmatpush3.bf16.msra.mxu0 %v1009_v11  ;;  %918 = vmatprep.mubr.msk.bf16.mxu0 %vm1157_vm0, %v1156_v1 }
  0xbd   : > { %904 = vmatprep.subr.bf16.mxu0 %v1156_v1 }
  0xc0   : > { %905 = vmatpush3.bf16.msra.mxu0 %v1010_v13 }
  0xc1   : > { %906 = vmatprep.subr.bf16.mxu0 %v1156_v1 }
  0xc4   : > { %907 = vmatpush3.bf16.msra.mxu0 %v1011_v14 }
  0xc5   : > { %908 = vmatprep.subr.bf16.mxu0 %v1156_v1 }
  0xc8   : > { %909 = vmatpush3.bf16.msra.mxu0 %v1012_v15 }
  0xc9   : > { %910 = vmatprep.subr.bf16.mxu0 %v1156_v1 }
  0xcc   : > { %911 = vmatpush3.bf16.msra.mxu0 %v1013_v16 }
  0xcd   : > { %912 = vmatprep.subr.bf16.mxu0 %v1156_v1 }
  0xd0   : > { %913 = vmatpush3.bf16.msra.mxu0 %v1014_v19 }
  0xd1   : > { %914 = vmatprep.subr.bf16.mxu0 %v1156_v1 }
  0xd4   : > { %915 = vmatpush3.bf16.msra.mxu0 %v1015_v22 }
  0xd5   : > { %916 = vmatprep.subr.bf16.mxu0 %v1156_v1 }
  0xd8   : > { %917 = vmatpush3.bf16.msra.mxu0 %v1016_v23 }
  0xfc   : > { %v482_v17 = vpop.f32.mrf.mxu1 }
  0xfe   : > { %v900_v18 = vpop.f32.mrf.mxu1 }
 0x100   : > { %v485_v20 = vpop.f32.mrf.mxu1 }
 0x102   : > { %v901_v21 = vpop.f32.mrf.mxu1 }
 0x17b   : > { %v432_v27 = vpop.f32.mrf.mxu0 }
 0x17c   : > { %v483_v29 = vadd.f32 %v482_v17, %v432_v27 }
 0x17d   : > { %v894_v30 = vpop.f32.mrf.mxu0 }
 0x17e   : > { %v495_v31 = vadd.f32 %v845_v28, %v483_v29 }
 0x17f   : > { %v435_v32 = vpop.f32.mrf.mxu0 }
 0x180   : > { %1025 = vtanh.f32 %v495_v31 }
 0x181   : > { %v895_v33 = vpop.f32.mrf.mxu0 }
 0x18d   : > { %v1026_v34 = vpop.eup %1025 }
 0x18e   : > { %v497_v35 = vpack.c.bf16 %v1026_v34, %v1026_v34 }
 0x190   : > { %919 = vmatmul.mubr.bf16.vlgmr.msra.gmra.mxu0 %v497_v35 }
 0x250   : > { %v603_v42 = vpop.f32.mrf.mxu0 }
 0x251   : > { %v604_v43 = vadd.f32 %v846_v41, %v603_v42 }
 0x252   : > { %v920_v44 = vpop.f32.mrf.mxu0 }
 0x253   : > { %1027 = vtanh.f32 %v604_v43 }
 0x254   : > { %v606_v45 = vpop.f32.mrf.mxu0 }
 0x256   : > { %v921_v46 = vpop.f32.mrf.mxu0 }
 0x260   : > { %v1028_v47 = vpop.eup %1027 }
 0x261   : > { %v610_v48 = vpack.c.bf16 %v1028_v47, %v1028_v47 }
 0x263   : > { %939 = vmatmul.mubr.bf16.vlgmr.msra.gmra.mxu1 %v610_v48 }
 0x323   : > { %v716_v50 = vpop.f32.mrf.mxu1 }
 0x324   : > { %v717_v51 = vadd.f32 %v855_v49, %v716_v50 }
 0x325   : > { %v940_v52 = vpop.f32.mrf.mxu1 }
 0x326   : > { %722 = vst [vmem:[%s366_s16] sm:$0xff] %v717_v51 }
 0x327   : > { %v719_v53 = vpop.f32.mrf.mxu1 }
 0x328   : > { %1094 = shalt.err (!%p1091_p3)
}
 0x329   : > { %s1095_s28 = scalar_lea.hbm %s1353_s5, 128  ;;  %s1099_s14 = scalar_lea.hbm %s1403_s9, 256 }
 0x32a   : > { %p1096_p2 = scmp.ne.s32.totalorder %s1353_s5, %s1095_s28  ;;  %p1100_p7 = scmp.lt.s32.totalorder %s1353_s5, %s1403_s9 }
 0x32b   : > { %p1101_p6 = scmp.lt.s32.totalorder %s1099_s14, %s1095_s28 }
 0x32c   : > { %p1097_p4 = pnand %p1096_p2, %p1247_p5 }
 0x32d   : > { %p1102_p9 = por %p1101_p6, %p1100_p7 }
 0x32e   : > { %p1098_p13 = pneg %p1097_p4 }
 0x330   : > { %p1103_p10 = pnand %p1102_p9, %p1098_p13 }
 0x332   : > { %1106 = shalt.err (!%p1103_p10)
}
 0x333   : > { %950 = dma.vmem_to_hbm [thread:$0]  (%p1247_p5), %s1355_s17, 128, %s1353_s5, %s724_s21   ;;  %v941_v54 = vpop.f32.mrf.mxu1 }
 0x334 PF: > { %p967_p12 = scmp.ge.s32.totalorder %s1149_s12, 2  ;;  %s749_s25 = sand.u32 1, %s1137_s30  }
 0x335   : > { %p1415_p8 = scmp.ne.s32.totalorder %s1407_s20, 0  ;;  %s750_s23 = scalar_lea.sflag [#allocation4], %s749_s25 }
 0x337   : > { %p960_p11 = pnand %p967_p12, %p1415_p8 }
 0x339   : > { %p961_p0 = pneg %p960_p11 }
 0x33b   : > { %1132 = dma.done.wait (%p961_p0), %s750_s23, 128  }
 0x33c   : > { %1134 = vsyncadd (%p961_p0), %s750_s23, 4294967168  ;;  %p21_p1 = scmp.ge.s32.totalorder %s1234_s15, 4   ;;  %s1416_s30 = smov %s1141_s10 }
 0x33d   : > { %s1417_s10 = smov %s1145_s11  ;;  %s1418_s11 = smov %s1245_s18 }
 0x33e   : > { %s1419_s12 = smov %s1234_s15  ;;  %23 = sbr.rel (!%p21_p1) target bundleno = 7 (0x7), region = 103 }
 0x343   :  { %755 = vsyncpa [#allocation3], 1 }
 0x344   :  { %757 = vsyncpa [#allocation3 + $0x1], 1 }
 0x345   :  { %758 = vsyncpa [#allocation6], 1 }
 0x346   :  { %759 = vsyncpa [#allocation4], 1 }
 0x347   :  { %761 = vsyncpa [#allocation4 + $0x1], 1 }

</bundles_post_ra>
